<compile_context>
chip_gen: v5e
topology: v5e:2x2
jax: 0.10.0
libtpu: 0.0.40
codegen_flags: <defaults>
</compile_context>

<pallas_src>
import functools

import jax
import jax.numpy as jnp
from jax.experimental import pallas as pl
from jax.experimental.pallas import tpu as pltpu


def _topk_hits_kernel(labels_ref, outputs_ref, partials_ref, *,
                      k, n, tn, labels_full, compute_dtype):
    """One grid step: count top-k hits for rows [i*tn, (i+1)*tn)."""
    i = pl.program_id(0)

    scores = outputs_ref[...]                          # (tn, C) stored dtype
    if scores.dtype != compute_dtype:
        scores = scores.astype(compute_dtype)          # f32 path (v5e / f16 / int)

    if labels_full:
        # Whole padded label vector sits in VMEM (constant block index ->
        # DMA'd once, not per step); slice this tile's rows out of it.
        start = pl.multiple_of(i * tn, tn)
        labels = labels_ref[pl.ds(start, tn), :]       # (tn, 1) i32
    else:
        labels = labels_ref[...]                       # (tn, 1) i32 per-tile block

    c = scores.shape[-1]
    col = jax.lax.broadcasted_iota(jnp.int32, scores.shape, 1)       # (tn, C)

    # Score of the labelled class: masked sum with exactly one nonzero term
    # (exact in any float dtype, including bf16).
    label_mask = col == labels
    label_score = jnp.sum(
        jnp.where(label_mask, scores, jnp.zeros((), scores.dtype)),
        axis=-1, keepdims=True)                                      # (tn, 1)

    # Rank of the labelled class: strictly-greater + equal-with-lower-index
    # tie-break (== lax.top_k / torch.topk membership).  Integer count.
    ahead = (scores > label_score) | ((scores == label_score) & (col < labels))
    rank = jnp.sum(ahead.astype(jnp.int32), axis=-1, keepdims=True)  # (tn, 1)

    # Mask padded rows of a partial last tile and padded / out-of-range labels.
    row = jax.lax.broadcasted_iota(jnp.int32, (tn, 1), 0) + i * tn
    valid = (row < n) & (labels >= 0) & (labels < c)
    hit = valid & (rank < k)                                         # (tn, 1)

    hit_count = jnp.sum(hit.astype(jnp.float32))                     # scalar f32

    # Lane-dense per-step partial: broadcast the scalar into this step's own
    # (1, 8, 128) output block (unmasked stores; grid axis stays "parallel").
    partials_ref[...] = jnp.zeros(partials_ref.shape, jnp.float32) + hit_count


_SUBLANE = {4: 8, 2: 16, 1: 32}   # dtype itemsize -> sublane multiple


def _generation_config():
    """Generation-aware tile budget / VMEM limit / compute-dtype policy."""
    kind = ""
    try:
        kind = jax.devices()[0].device_kind.lower()
    except Exception:
        pass
    if "v7" in kind or "7x" in kind:
        # v7x: 2 TCs, 64 MiB VMEM/TC (scoped default 32 MiB), bf16 VPU.
        cfg = {"budget": 4 << 20, "row_cap": 2048, "vmem_limit": 48 << 20,
               "native": True}
    elif "v6" in kind:
        # v6e: 1 TC, 128 MiB VMEM (scoped default 32 MiB), bf16 VPU.
        cfg = {"budget": 8 << 20, "row_cap": 2048, "vmem_limit": 96 << 20,
               "native": True}
    else:
        # v5e / v5p / v4 / unknown: no bf16 VPU assumed, small scoped default.
        cfg = {"budget": 2 << 20, "row_cap": 1024, "vmem_limit": 32 << 20,
               "native": False}
    try:  # clamp to physical VMEM capacity when the query is available
        cap = int(pltpu.get_tpu_info().vmem_capacity_bytes)
        cfg["vmem_limit"] = max(16 << 20, min(cfg["vmem_limit"], cap - (8 << 20)))
    except Exception:
        pass
    return cfg


def _pick_tile_rows(n, c, itemsize, *, budget, row_cap, block_rows):
    """Rows per tile: dtype-dependent sublane multiple, scores tile <= budget."""
    sub = _SUBLANE.get(itemsize, 8)
    n_pad = ((n + sub - 1) // sub) * sub
    if block_rows is not None:
        tn = ((max(1, block_rows) + sub - 1) // sub) * sub
    else:
        tn = budget // max(1, c * itemsize)
        tn = max(sub, (tn // sub) * sub)
        tn = min(tn, row_cap)
    return min(tn, n_pad)


def topk_error(labels, outputs, *, k=1, percent=True, block_rows=None,
               full_labels=None):
    """JAX/Pallas equivalent of TopKError.forward(labels, outputs)."""
    labels = jnp.squeeze(jnp.asarray(labels)).astype(jnp.int32)
    outputs = jnp.squeeze(jnp.asarray(outputs))
    # NOTE: like the torch module, .squeeze() is ambiguous for C == 1; the
    # common (N, C>1) and single-sample (C,) cases are handled below.
    if outputs.dtype not in (jnp.float32, jnp.bfloat16, jnp.float16):
        outputs = outputs.astype(jnp.float32)          # ints / f64 / fp8 -> f32
    if outputs.ndim == 1:
        outputs = outputs[None, :]
    labels = labels.reshape(-1)

    n, c = outputs.shape
    k = int(k)

    cfg = _generation_config()
    itemsize = jnp.dtype(outputs.dtype).itemsize
    tn = _pick_tile_rows(n, c, itemsize, budget=cfg["budget"],
                         row_cap=cfg["row_cap"], block_rows=block_rows)
    num_tiles = pl.cdiv(n, tn)
    n_pad = num_tiles * tn

    # Compute in the stored dtype on bf16-capable VPUs; f32 otherwise.
    if cfg["native"] and outputs.dtype in (jnp.float32, jnp.bfloat16):
        compute_dtype = outputs.dtype
    else:
        compute_dtype = jnp.float32

    # Pad labels to a whole number of tiles with -1 (never counts as a hit).
    if n_pad != n:
        labels = jnp.concatenate(
            [labels, jnp.full((n_pad - n,), -1, dtype=jnp.int32)])
    labels2d = labels.reshape(n_pad, 1)

    # Load labels once (constant block index) when the lane-padded (n_pad, 1)
    # VMEM buffer is small; otherwise fall back to per-tile label blocks.
    if full_labels is None:
        full_labels = n_pad * 512 <= (4 << 20)   # (n_pad,1) i32 lane-pads to 128
    if full_labels:
        labels_spec = pl.BlockSpec((n_pad, 1), lambda i: (0, 0))
    else:
        labels_spec = pl.BlockSpec((tn, 1), lambda i: (i, 0))

    cost = pl.CostEstimate(
        flops=6 * n * c,                         # compares / selects / counts
        transcendentals=0,
        bytes_accessed=n * c * itemsize + n_pad * 4 + num_tiles * 8 * 128 * 4,
    )

    partials = pl.pallas_call(
        functools.partial(_topk_hits_kernel, k=k, n=n, tn=tn,
                          labels_full=full_labels, compute_dtype=compute_dtype),
        out_shape=jax.ShapeDtypeStruct((num_tiles, 8, 128), jnp.float32),
        grid_spec=pltpu.PrefetchScalarGridSpec(
            num_scalar_prefetch=0,
            grid=(num_tiles,),
            in_specs=[
                labels_spec,
                pl.BlockSpec((tn, c), lambda i: (i, 0)),
            ],
            out_specs=pl.BlockSpec((1, 8, 128), lambda i: (i, 0, 0)),
        ),
        compiler_params=pltpu.CompilerParams(
            dimension_semantics=("parallel",),   # independent per-tile partials
            vmem_limit_bytes=cfg["vmem_limit"],
        ),
        cost_estimate=cost,
    )(labels2d, outputs)

    hits = jnp.sum(partials[:, 0, 0])
    acc = hits / jnp.float32(n)
    err = jnp.float32(1.0) - acc
    if percent:
        err = jnp.float32(100.0) * err
    return err


def _topk_error_ref(labels, outputs, *, k=1, percent=True):
    """Pure-JAX reference matching the PyTorch semantics."""
    labels = jnp.squeeze(labels).astype(jnp.int32)
    outputs = jnp.squeeze(outputs).astype(jnp.float32)
    _, topk = jax.lax.top_k(outputs, k)                           # (N, k)
    acc = jnp.mean(jnp.sum((topk == labels[:, None]).astype(jnp.float32), axis=-1))
    err = 1.0 - acc
    return 100.0 * err if percent else err


if __name__ == "__main__":
    key = jax.random.PRNGKey(0)
    k1, k2, k3, k4, k5, k6 = jax.random.split(key, 6)

    # Test 1: small f32 case (batch=8, 32 classes) -> single tile, k=1.
    N, C = 8, 32
    outputs = jax.random.normal(k1, (N, C), dtype=jnp.float32)
    labels = jax.random.randint(k2, (N,), 0, C, dtype=jnp.int32)
    err = jax.block_until_ready(topk_error(labels, outputs, k=1, percent=True))
    ref = _topk_error_ref(labels, outputs, k=1, percent=True)
    assert abs(float(err) - float(ref)) < 1e-4, (float(err), float(ref))

    # Test 2: bf16 inputs, multi-tile "parallel" grid with a partial last tile
    # (44 rows, 16-row tiles -> 3 steps), k=5, full-labels VMEM path.
    N2, C2 = 44, 160
    outputs2 = jax.random.normal(k3, (N2, C2), dtype=jnp.bfloat16)
    labels2 = jax.random.randint(k4, (N2,), 0, C2, dtype=jnp.int32)
    err2 = jax.block_until_ready(
        topk_error(labels2, outputs2, k=5, percent=True, block_rows=16))
    ref2 = _topk_error_ref(labels2, outputs2.astype(jnp.float32), k=5, percent=True)
    assert abs(float(err2) - float(ref2)) < 1e-3, (float(err2), float(ref2))

    # Test 3: per-tile labels fallback path, f32, k=3, partial last tile.
    N3, C3 = 20, 96
    outputs3 = jax.random.normal(k5, (N3, C3), dtype=jnp.float32)
    labels3 = jax.random.randint(k6, (N3,), 0, C3, dtype=jnp.int32)
    err3 = jax.block_until_ready(
        topk_error(labels3, outputs3, k=3, percent=True, block_rows=8,
                   full_labels=False))
    ref3 = _topk_error_ref(labels3, outputs3, k=3, percent=True)
    assert abs(float(err3) - float(ref3)) < 1e-4, (float(err3), float(ref3))

    print("KERNEL_OK")
</pallas_src>

<mosaic_0001>
module attributes {stable_mosaic.version = 11 : i64} {
  func.func @_topk_hits_kernel(%arg0: i32, %arg1: memref<8x1xi32, #tpu.memory_space<vmem>>, %arg2: memref<8x32xf32, #tpu.memory_space<vmem>>, %arg3: memref<1x8x128xf32, #tpu.memory_space<vmem>>) attributes {dimension_semantics = [#tpu.dimension_semantics<parallel>], iteration_bounds = array<i64: 1>, scalar_prefetch = 0 : i64, scratch_operands = 0 : i64, tpu.core_type = #tpu.core_type<tc>, window_params = [{pipeline_mode = #tpu.pipeline_mode<synchronous>, transform_indices = @transform_0, window_bounds = array<i64: 8, 1>}, {transform_indices = @transform_1, window_bounds = array<i64: 8, 32>}, {transform_indices = @transform_2, window_bounds = array<i64: 1, 8, 128>}]} {
    %c0 = arith.constant 0 : index
    %c0_0 = arith.constant 0 : index
    %0 = vector.load %arg2[%c0, %c0_0] : memref<8x32xf32, #tpu.memory_space<vmem>>, vector<8x32xf32>
    %c8_i32 = arith.constant 8 : i32
    %1 = arith.muli %arg0, %c8_i32 : i32
    %2 = tpu.assume_multiple %1, 8 : i32
    %3 = arith.index_cast %2 : i32 to index
    %c0_1 = arith.constant 0 : index
    %4 = vector.load %arg1[%3, %c0_1] : memref<8x1xi32, #tpu.memory_space<vmem>>, vector<8x1xi32>
    %5 = tpu.iota {dimensions = array<i32: 1>} : vector<8x32xi32>
    %6 = vector.broadcast %4 : vector<8x1xi32> to vector<8x32xi32>
    %7 = arith.cmpi eq, %5, %6 : vector<8x32xi32>
    %cst = arith.constant 0.000000e+00 : f32
    %8 = vector.broadcast %cst : f32 to vector<8x32xf32>
    %9 = arith.select %7, %0, %8 : vector<8x32xi1>, vector<8x32xf32>
    %cst_2 = arith.constant dense<0.000000e+00> : vector<8xf32>
    %10 = vector.multi_reduction <add>, %9, %cst_2 [1] : vector<8x32xf32> to vector<8xf32>
    %11 = vector.shape_cast %10 : vector<8xf32> to vector<8x1xf32>
    %12 = vector.broadcast %11 : vector<8x1xf32> to vector<8x32xf32>
    %13 = arith.cmpf ogt, %0, %12 : vector<8x32xf32>
    %14 = vector.broadcast %11 : vector<8x1xf32> to vector<8x32xf32>
    %15 = arith.cmpf oeq, %0, %14 : vector<8x32xf32>
    %16 = vector.broadcast %4 : vector<8x1xi32> to vector<8x32xi32>
    %17 = arith.cmpi slt, %5, %16 : vector<8x32xi32>
    %18 = arith.andi %15, %17 : vector<8x32xi1>
    %19 = arith.ori %13, %18 : vector<8x32xi1>
    %20 = arith.extui %19 : vector<8x32xi1> to vector<8x32xi32>
    %cst_3 = arith.constant dense<0> : vector<8xi32>
    %21 = vector.multi_reduction <add>, %20, %cst_3 [1] : vector<8x32xi32> to vector<8xi32>
    %22 = vector.shape_cast %21 : vector<8xi32> to vector<8x1xi32>
    %23 = tpu.iota {dimensions = array<i32: 0>} : vector<8x1xi32>
    %c8_i32_4 = arith.constant 8 : i32
    %24 = arith.muli %arg0, %c8_i32_4 : i32
    %25 = vector.broadcast %24 : i32 to vector<8x1xi32>
    %26 = arith.addi %23, %25 : vector<8x1xi32>
    %c8_i32_5 = arith.constant 8 : i32
    %27 = vector.broadcast %c8_i32_5 : i32 to vector<8x1xi32>
    %28 = arith.cmpi slt, %26, %27 : vector<8x1xi32>
    %c0_i32 = arith.constant 0 : i32
    %29 = vector.broadcast %c0_i32 : i32 to vector<8x1xi32>
    %30 = arith.cmpi sge, %4, %29 : vector<8x1xi32>
    %31 = arith.andi %28, %30 : vector<8x1xi1>
    %c32_i32 = arith.constant 32 : i32
    %32 = vector.broadcast %c32_i32 : i32 to vector<8x1xi32>
    %33 = arith.cmpi slt, %4, %32 : vector<8x1xi32>
    %34 = arith.andi %31, %33 : vector<8x1xi1>
    %c1_i32 = arith.constant 1 : i32
    %35 = vector.broadcast %c1_i32 : i32 to vector<8x1xi32>
    %36 = arith.cmpi slt, %22, %35 : vector<8x1xi32>
    %37 = arith.andi %34, %36 : vector<8x1xi1>
    %38 = arith.extui %37 : vector<8x1xi1> to vector<8x1xi32>
    %39 = arith.sitofp %38 : vector<8x1xi32> to vector<8x1xf32>
    %40 = vector.shape_cast %39 : vector<8x1xf32> to vector<1x8x1xf32>
    %cst_6 = arith.constant dense<0.000000e+00> : vector<1xf32>
    %41 = vector.multi_reduction <add>, %40, %cst_6 [1, 2] : vector<1x8x1xf32> to vector<1xf32>
    %42 = vector.shape_cast %41 : vector<1xf32> to vector<1x1x1xf32>
    %43 = vector.extract %42[0, 0, 0] : f32 from vector<1x1x1xf32>
    %cst_7 = arith.constant 0.000000e+00 : f32
    %44 = vector.broadcast %cst_7 : f32 to vector<1x8x128xf32>
    %45 = vector.broadcast %43 : f32 to vector<1x8x128xf32>
    %46 = arith.addf %44, %45 : vector<1x8x128xf32>
    %c0_8 = arith.constant 0 : index
    %c0_9 = arith.constant 0 : index
    %c0_10 = arith.constant 0 : index
    %47 = vector.load %arg3[%c0_8, %c0_9, %c0_10] : memref<1x8x128xf32, #tpu.memory_space<vmem>>, vector<1x8x128xf32>
    tpu.vector_store %arg3[%c0_8, %c0_9, %c0_10], %46 {strides = array<i32>} : memref<1x8x128xf32, #tpu.memory_space<vmem>>, vector<1x8x128xf32>,
    return
  }
  func.func @transform_0(%arg0: i32) -> (i32, i32) {
    %c0_i32 = arith.constant 0 : i32
    %c0_i32_0 = arith.constant 0 : i32
    %c0_i32_1 = arith.constant 0 : i32
    return %c0_i32, %c0_i32_0 : i32, i32
  }
  func.func @transform_1(%arg0: i32) -> (i32, i32) {
    %c0_i32 = arith.constant 0 : i32
    %c0_i32_0 = arith.constant 0 : i32
    return %arg0, %c0_i32 : i32, i32
  }
  func.func @transform_2(%arg0: i32) -> (i32, i32, i32) {
    %c0_i32 = arith.constant 0 : i32
    %c0_i32_0 = arith.constant 0 : i32
    %c0_i32_1 = arith.constant 0 : i32
    return %arg0, %c0_i32, %c0_i32_0 : i32, i32, i32
  }
}

</mosaic_0001>

<bundles_post_ra>
// kernel: tpu_custom_call.1
= control target key start
LH: loop header
LB: loop body
LE: loop exit
PB: predicated region body
PF: predicated region fallthrough
CT: control target
= control target key end

     0   :  { %s149_s0 = inlined_call_operand.vmem [shape: s32[8,1], index: 0, kind: input, shape index: {}]   ;;  %s150_s1 = inlined_call_operand.vmem [shape: f32[8,32], index: 1, kind: input, shape index: {}]   ;;  %s151_s2 = inlined_call_operand.hbm [shape: f32[1,8,128], index: 2, kind: output, shape index: {}]  }
   0x1   :  { %v15_v0 = vld [vmem:[%s149_s0] sm:$0xff] }
   0x2   :  { %7 = vsyncpa [#allocation3], 0  ;;  %v122_v1 = vmov 0   ;;  %v16_v2 = vlaneseq  ;;  %v12_v4 = vld [vmem:[%s150_s1] sm:$0xff]  ;;  %vm23_vm0 = vcmask 261120   ;;  %vm51_vm7 = vcmp.ge.s32.totalorder %v15_v0, 0 }
   0x3   :  { %95 = vset.pattern.permute.xlu0 %v122_v1  ;;  %vm53_vm8 = vcmp.lt.s32.totalorder %v15_v0, 32  ;;  %vm59_vm11 = vcmask 7168   ;;  %v123_v21 = vmov 0.0   ;;  %s124_s0 = smov [#allocation2]   ;;  %s80_s15 = sshll.u32 %s151_s2, 4  ;;  %s81_s15 = int_to_ptr.hbm [resolvable:$true] %s80_s15 }
   0x4   :  { %19 = vperm.xlu0 %95, %v15_v0   ;;  %v17_v3 = vand.u32 127, %v16_v2  ;;  %vm54_vm9 = vmand %vm51_vm7, %vm53_vm8  ;;  %s78_s1 = sshll.u32 %s124_s0, 4  ;;  %s79_s1 = int_to_ptr.vmem [resolvable:$true] %s78_s1 }
  0x76   :  { %v20_v5 = vpop.permute.xlu0 %19 }
  0x77   :  { %vm21_vm1 = vcmp.eq.s32.totalorder %v17_v3, %v20_v5  ;;  %vm29_vm2 = vcmp.lt.s32.totalorder %v17_v3, %v20_v5 }
  0x78   :  { %v22_v6 = vsel %vm21_vm1, %v12_v4, 0.0 }
  0x79   :  { %v24_v7 = vsel %vm23_vm0, %v22_v6, 0.0 }
  0x7a   :  { %25 = vadd.xlane.f32.xlu0 %v24_v7 }
  0xed   :  { %v26_v8 = vpop.xlane.xlu0 %25 }
  0xee   :  { %vm27_vm3 = vcmp.gt.f32.partialorder %v12_v4, %v26_v8  ;;  %vm28_vm4 = vcmp.eq.f32.partialorder %v12_v4, %v26_v8 }
  0xef   :  { %vm30_vm5 = vmand %vm28_vm4, %vm29_vm2 }
  0xf0   :  { %vm31_vm6 = vmor %vm27_vm3, %vm30_vm5 }
  0xf1   :  { %v32_v9 = vsel %vm31_vm6, 1, %v122_v1 }
  0xf2   :  { %v33_v10 = vsel %vm23_vm0, %v32_v9, 0 }
  0xf3   :  { %v35_v11 = vshrl.u32 %v33_v10, 16  ;;  %v34_v13 = vand.u32 65535, %v33_v10 }
  0xf5   :  { %v37_v12 = vcvt.s32.f32 %v35_v11  ;;  %v36_v14 = vcvt.s32.f32 %v34_v13 }
  0xf7   :  { %40 = vadd.xlane.f32.xlu1 %v37_v12 }
  0xff   :  { %38 = vadd.xlane.f32.xlu1 %v36_v14 }
 0x16a   :  { %v41_v15 = vpop.xlane.xlu1 %40 }
 0x16b   :  { %v43_v16 = vcvt.f32.s32 %v41_v15 }
 0x16d   :  { %v44_v18 = vshll.u32 %v43_v16, 16 }
 0x172   :  { %v39_v17 = vpop.xlane.xlu1 %38 }
 0x173   :  { %v42_v19 = vcvt.f32.s32 %v39_v17 }
 0x175   :  { %v45_v20 = vadd.s32 %v44_v18, %v42_v19 }
 0x177   :  { %vm55_vm10 = vcmp.lt.s32.totalorder %v45_v20, 1 }
 0x178   :  { %vm56_vm12 = vmand %vm54_vm9, %vm55_vm10 }
 0x179   :  { %v89_v22 = vsel %vm56_vm12, 1.0, %v123_v21 }
 0x17a   :  { %v60_v23 = vsel %vm59_vm11, %v89_v22, 0.0 }
 0x17b   :  { %61 = vadd.xlane.f32.xlu2 %v60_v23 }
 0x1ee   :  { %v62_v24 = vpop.xlane.xlu2 %61 }
 0x1ef   :  { %v63_v25 = vrot.slane %v62_v24, 4 }
 0x1f1   :  { %v64_v26 = vadd.f32 %v63_v25, %v62_v24 }
 0x1f3   :  { %v65_v27 = vrot.slane %v64_v26, 2 }
 0x1f5   :  { %v66_v28 = vadd.f32 %v65_v27, %v64_v26 }
 0x1f7   :  { %v67_v29 = vrot.slane %v66_v28, 1 }
 0x1f9   :  { %v68_v30 = vadd.f32 %v67_v29, %v66_v28 }
 0x1fb   :  { %90 = vpush %v68_v30 }
 0x22c   :  { %s91_s16 = spop %90 }
 0x22d   :  { %v70_v31 = vstv %s91_s16 }
 0x22e   :  { %72 = vst [vmem:[#allocation2] sm:$0xff] %v70_v31 }
 0x22f   :  { %83 = dma.vmem_to_hbm [thread:$0]  %s79_s1, 128, %s81_s15, [#allocation3]  }
 0x230   :  { %120 = dma.done.wait [#allocation3], 128  }
 0x231   :  { %121 = vsyncadd [#allocation3], 4294967168 }
 0x232   :  { %88 = vsyncpa [#allocation3], 1 }

</bundles_post_ra>
